<compile_context>
chip_gen: v5e
topology: v5e:2x2
jax: 0.10.0
libtpu: 0.0.40
codegen_flags: <defaults>
</compile_context>

<pallas_src>
import jax
import jax.numpy as jnp
from jax.experimental import pallas as pl
from jax.experimental.pallas import tpu as pltpu

NEURON = 100              # valid feature width
PAD = 128                 # lane-aligned feature dim (carrier unit at column NEURON)
ROWS = 8                  # sublane-aligned batch dim (valid row is row 0)
TOTAL_ROWS = PAD + 2 * ROWS   # 144: [W2aug | h1 tile | w3-row tile]


def _mlp_kernel(op_ref, o_ref):
    # op_ref : (TOTAL_ROWS, PAD) coalesced operand.
    #   rows   0..127 : augmented W2 (b2 in row NEURON, 1.0 at [NEURON, NEURON])
    #   rows 128..135 : h1 = relu(ones @ W1 + b1) in row 128, carrier 1.0 at col NEURON
    #   rows 136..143 : layer-3 row in row 136 (W3[:,0] in cols 0..99, b3 at col NEURON)
    # o_ref  : (ROWS, PAD) lane-dense output tile; valid scalar at [0, 0].
    w2 = op_ref[0:PAD, :]                          # (128, 128)
    h1 = op_ref[PAD:PAD + ROWS, :]                 # (8, 128) already ReLU'd + carrier
    w3 = op_ref[PAD + ROWS:PAD + 2 * ROWS, :]      # (8, 128) row 0 valid

    # Layer 2: single MXU matmul (bias folded into row NEURON of W2aug) + ReLU.
    h2 = jnp.maximum(
        jnp.dot(h1, w2, preferred_element_type=jnp.float32), 0.0)  # (8, 128)

    # Layer 3: VPU elementwise multiply + XLU lane reduce (no MXU matmul).
    # Rows 1..7 of both h2 and w3 are zero, so only row 0 contributes.
    out_col = jnp.sum(h2 * w3, axis=-1, keepdims=True)             # (8, 1)
    o_ref[...] = jnp.broadcast_to(out_col, (ROWS, PAD))


def prepare_params(params):
    """One-time folding/padding of PyTorch-style params into a single kernel operand.

    Returns:
      op : (TOTAL_ROWS, PAD) f32 coalesced operand (see _mlp_kernel docstring).
    """
    w1, b1, w2, b2, w3, b3 = (jnp.asarray(p, jnp.float32) for p in params)

    # Fold layer 1 entirely: relu(ones(1,100) @ W1 + b1) == relu(colsum(W1) + b1).
    h1 = jnp.maximum(jnp.sum(w1, axis=0) + b1, 0.0)                # (100,)

    op = jnp.zeros((TOTAL_ROWS, PAD), jnp.float32)

    # Augmented W2: rows 0..99 = W2, row 100 cols 0..99 = b2,
    # [100,100] = 1 so the bias-carrier unit propagates to h2.
    op = op.at[:NEURON, :NEURON].set(w2)
    op = op.at[NEURON, :NEURON].set(b2)
    op = op.at[NEURON, NEURON].set(1.0)

    # h1 tile: row PAD holds the folded layer-1 activation + carrier 1.0.
    op = op.at[PAD, :NEURON].set(h1)
    op = op.at[PAD, NEURON].set(1.0)

    # Layer-3 row: W3[:,0] in cols 0..99, b3 at col 100 (picks up the carrier).
    op = op.at[PAD + ROWS, :NEURON].set(w3[:, 0])
    op = op.at[PAD + ROWS, NEURON].set(b3[0])
    return op


@jax.jit
def muJz_net_forward(op, r=None):
    """Pallas equivalent of muJz_net.forward(r). `r` is ignored (as in PyTorch)."""
    out = pl.pallas_call(
        _mlp_kernel,
        out_shape=jax.ShapeDtypeStruct((ROWS, PAD), jnp.float32),
        in_specs=[
            pl.BlockSpec((TOTAL_ROWS, PAD), lambda: (0, 0),
                         memory_space=pltpu.VMEM),
        ],
        out_specs=pl.BlockSpec((ROWS, PAD), lambda: (0, 0),
                               memory_space=pltpu.VMEM),
    )(op)
    # TODO(synk): PyTorch forward also assigns the result to a global
    # `model.muJz` (side effect on another module); no kernel equivalent.
    return out[0:1, 0:1]  # (1, 1), matching the torch output shape


def init_params(key):
    """Deterministic init matching PyTorch Linear default scale U(-1/sqrt(in), 1/sqrt(in)).

    Weights stored as (in_features, out_features) so y = x @ W + b.
    """
    ks = jax.random.split(key, 6)

    def lin(kw, kb, fan_in, fan_out):
        bound = 1.0 / jnp.sqrt(jnp.float32(fan_in))
        w = jax.random.uniform(kw, (fan_in, fan_out), jnp.float32, -bound, bound)
        b = jax.random.uniform(kb, (fan_out,), jnp.float32, -bound, bound)
        return w, b

    w1, b1 = lin(ks[0], ks[1], NEURON, NEURON)
    w2, b2 = lin(ks[2], ks[3], NEURON, NEURON)
    w3, b3 = lin(ks[4], ks[5], NEURON, 1)
    return (w1, b1, w2, b2, w3, b3)


def _reference(params):
    w1, b1, w2, b2, w3, b3 = params
    hp = jax.lax.Precision.HIGHEST
    x = jnp.ones((1, NEURON), dtype=jnp.float32)
    h1 = jnp.maximum(jnp.dot(x, w1, precision=hp) + b1, 0.0)
    h2 = jnp.maximum(jnp.dot(h1, w2, precision=hp) + b2, 0.0)
    return jnp.dot(h2, w3, precision=hp) + b3


if __name__ == "__main__":
    key = jax.random.PRNGKey(0)
    params = init_params(key)

    # One-time parameter preparation (all padding / folding hoisted out of forward).
    op = jax.block_until_ready(prepare_params(params))

    # `r` argument is unused by the module's forward; provide a small dummy.
    r = jax.random.uniform(jax.random.PRNGKey(1), (8, 1), jnp.float32)

    out = muJz_net_forward(op, r)
    out = jax.block_until_ready(out)

    ref = _reference(params)
    assert out.shape == (1, 1), out.shape
    assert jnp.allclose(out, ref, rtol=1e-5, atol=1e-5), (out, ref)
    print("KERNEL_OK")
</pallas_src>

<mosaic_0001>
module attributes {stable_mosaic.version = 11 : i64} {
  func.func @_mlp_kernel(%arg0: memref<144x128xf32, #tpu.memory_space<vmem>>, %arg1: memref<8x128xf32, #tpu.memory_space<vmem>>) attributes {dimension_semantics = [], scalar_prefetch = 0 : i64, scratch_operands = 0 : i64, tpu.core_type = #tpu.core_type<tc>} {
    %c0 = arith.constant 0 : index
    %c0_0 = arith.constant 0 : index
    %0 = vector.load %arg0[%c0, %c0_0] : memref<144x128xf32, #tpu.memory_space<vmem>>, vector<128x128xf32>
    %c128 = arith.constant 128 : index
    %c0_1 = arith.constant 0 : index
    %1 = vector.load %arg0[%c128, %c0_1] : memref<144x128xf32, #tpu.memory_space<vmem>>, vector<8x128xf32>
    %c136 = arith.constant 136 : index
    %c0_2 = arith.constant 0 : index
    %2 = vector.load %arg0[%c136, %c0_2] : memref<144x128xf32, #tpu.memory_space<vmem>>, vector<8x128xf32>
    %cst = arith.constant dense<0.000000e+00> : vector<8x128xf32>
    %3 = tpu.matmul %1, %0, %cst {dimension_numbers = #tpu.dot_dimension_numbers<[1], [0], [0], [1], [0, 0, 1, 1], [], []>} : vector<8x128xf32>, vector<128x128xf32>, vector<8x128xf32> -> vector<8x128xf32>
    %cst_3 = arith.constant 0.000000e+00 : f32
    %4 = vector.broadcast %cst_3 : f32 to vector<8x128xf32>
    %5 = arith.maximumf %3, %4 : vector<8x128xf32>
    %6 = arith.mulf %5, %2 : vector<8x128xf32>
    %cst_4 = arith.constant dense<0.000000e+00> : vector<8xf32>
    %7 = vector.multi_reduction <add>, %6, %cst_4 [1] : vector<8x128xf32> to vector<8xf32>
    %8 = vector.shape_cast %7 : vector<8xf32> to vector<8x1xf32>
    %9 = vector.shape_cast %8 : vector<8x1xf32> to vector<8x1xf32>
    %10 = vector.broadcast %9 : vector<8x1xf32> to vector<8x128xf32>
    %c0_5 = arith.constant 0 : index
    %c0_6 = arith.constant 0 : index
    %11 = vector.load %arg1[%c0_5, %c0_6] : memref<8x128xf32, #tpu.memory_space<vmem>>, vector<8x128xf32>
    tpu.vector_store %arg1[%c0_5, %c0_6], %10 {strides = array<i32>} : memref<8x128xf32, #tpu.memory_space<vmem>>, vector<8x128xf32>,
    return
  }
}

</mosaic_0001>

<bundles_post_ra>
// kernel: muJz_net_forward.1
= control target key start
LH: loop header
LB: loop body
LE: loop exit
PB: predicated region body
PF: predicated region fallthrough
CT: control target
= control target key end

     0   :  { %6 = vsyncpa [#allocation3], 0  ;;  %s101_s9 = smov [#allocation2]   ;;  %s102_s11 = smov 128   ;;  %s120_s0 = inlined_call_operand.hbm [shape: f32[144,128], index: 0, kind: input, shape index: {}]   ;;  %s121_s1 = inlined_call_operand.vmem [shape: f32[8,128], index: 1, kind: output, shape index: {}]  }
   0x1   :  { %s11_s8 = sshll.u32 %s120_s0, 4  ;;  %s13_s10 = sshll.u32 %s101_s9, 4  ;;  %s12_s8 = int_to_ptr.hbm [resolvable:$true] %s11_s8  ;;  %s14_s10 = int_to_ptr.vmem [resolvable:$true] %s13_s10 }
   0x2   :  { %s103_s12 = smov 8  }
   0x3   :  { %19 = dma.hbm_to_vmem [thread:$0]  %s12_s8, 2304, %s14_s10, [#allocation3], %s102_s11, %s102_s11, %s103_s12  }
   0x4   :  { %99 = dma.done.wait [#allocation3], 2304  }
   0x5   :  { %100 = vsyncadd [#allocation3], 4294964992  ;;  %v39_v0 = vld [vmem:[#allocation2 + $0x78] sm:$0xff]  ;;  %v38_v1 = vld [vmem:[#allocation2 + $0x70] sm:$0xff] }
   0x6   :  { %42 = vmatpush.msra.mxu0 %v39_v0  ;;  %v37_v2 = vld [vmem:[#allocation2 + $0x68] sm:$0xff]  ;;  %v36_v3 = vld [vmem:[#allocation2 + $0x60] sm:$0xff]  ;;  %v35_v4 = vld [vmem:[#allocation2 + $0x58] sm:$0xff] }
   0x7   :  { %v34_v5 = vld [vmem:[#allocation2 + $0x50] sm:$0xff]  ;;  %v33_v6 = vld [vmem:[#allocation2 + $0x48] sm:$0xff]  ;;  %v32_v7 = vld [vmem:[#allocation2 + $0x40] sm:$0xff] }
   0x8   :  { %43 = vmatpush.msra.mxu0 %v38_v1  ;;  %v31_v8 = vld [vmem:[#allocation2 + $0x38] sm:$0xff]  ;;  %v30_v9 = vld [vmem:[#allocation2 + $0x30] sm:$0xff]  ;;  %v29_v10 = vld [vmem:[#allocation2 + $0x28] sm:$0xff] }
   0x9   :  { %v28_v11 = vld [vmem:[#allocation2 + $0x20] sm:$0xff]  ;;  %v27_v12 = vld [vmem:[#allocation2 + $0x18] sm:$0xff]  ;;  %v26_v13 = vld [vmem:[#allocation2 + $0x10] sm:$0xff] }
   0xa   :  { %44 = vmatpush.msra.mxu0 %v37_v2  ;;  %v25_v14 = vld [vmem:[#allocation2 + $0x8] sm:$0xff]  ;;  %v24_v15 = vld [vmem:[#allocation2] sm:$0xff] }
   0xb   :  { %v40_v16 = vld [vmem:[#allocation2 + $0x80] sm:$0xff]  ;;  %v41_v18 = vld [vmem:[#allocation2 + $0x88] sm:$0xff] }
   0xc   :  { %45 = vmatpush.msra.mxu0 %v36_v3 }
   0xe   :  { %46 = vmatpush.msra.mxu0 %v35_v4 }
  0x10   :  { %47 = vmatpush.msra.mxu0 %v34_v5 }
  0x12   :  { %48 = vmatpush.msra.mxu0 %v33_v6 }
  0x14   :  { %49 = vmatpush.msra.mxu0 %v32_v7 }
  0x16   :  { %50 = vmatpush.msra.mxu0 %v31_v8 }
  0x18   :  { %51 = vmatpush.msra.mxu0 %v30_v9 }
  0x1a   :  { %52 = vmatpush.msra.mxu0 %v29_v10 }
  0x1c   :  { %53 = vmatpush.msra.mxu0 %v28_v11 }
  0x1e   :  { %54 = vmatpush.msra.mxu0 %v27_v12 }
  0x20   :  { %55 = vmatpush.msra.mxu0 %v26_v13 }
  0x22   :  { %56 = vmatpush.msra.mxu0 %v25_v14 }
  0x24   :  { %57 = vmatpush.msra.mxu0 %v24_v15 }
  0x25   :  { %58 = vmatmul.f32.vlgmr.msra.gmra.mxu0 %v40_v16 }
  0xa2   :  { %v59_v17 = vpop.f32.mrf.mxu0 }
  0xa3   :  { %v62_v19 = vmax.f32 %v59_v17, 0.0 }
  0xa5   :  { %v63_v20 = vmul.f32 %v62_v19, %v41_v18 }
  0xa7   :  { %64 = vadd.xlane.f32.xlu0 %v63_v20 }
 0x11a   :  { %v65_v21 = vpop.xlane.xlu0 %64 }
 0x11b   :  { %66 = vst [vmem:[%s121_s1] sm:$0xff] %v65_v21 }
 0x11c   :  { %71 = vsyncpa [#allocation3], 1 }

</bundles_post_ra>
